<compile_context>
chip_gen: v5e
topology: v5e:2x2
jax: 0.10.0
libtpu: 0.0.40
codegen_flags: <defaults>
</compile_context>

<pallas_src>
import jax
import jax.numpy as jnp
from jax.experimental import pallas as pl
from jax.experimental.pallas import tpu as pltpu


# ----------------------------------------------------------------------------
# Kernels
# ----------------------------------------------------------------------------
def _epilogue(pooled_f32, w1_ref, w2_ref, o_ref):
    """pooled (bt, C) f32 -> o_ref[...] = sigmoid(relu(pooled @ W1) @ W2)."""
    h = jnp.dot(pooled_f32, w1_ref[...], preferred_element_type=jnp.float32)  # fc1 (1x1 conv)
    h = jnp.maximum(h, 0.0)                                                   # ReLU
    s = jnp.dot(h, w2_ref[...], preferred_element_type=jnp.float32)           # fc2 (Linear)
    o_ref[...] = jax.nn.sigmoid(s).astype(o_ref.dtype)                        # Sigmoid


def _make_single_step_kernel(inv_hw: float, channels_last: bool):
    """Whole HW fits one block: pool + fc1 + relu + fc2 + sigmoid in one shot."""
    reduce_axis = 1 if channels_last else 2

    def kernel(x_ref, w1_ref, w2_ref, o_ref):
        pooled = jnp.sum(x_ref[...].astype(jnp.float32), axis=reduce_axis) * inv_hw
        _epilogue(pooled, w1_ref, w2_ref, o_ref)

    return kernel


def _make_multi_step_nchw_kernel(bt: int, c: int, ht: int, inv_hw: float):
    """x blocks (bt, C, ht), HW on lanes, ht % 128 == 0.

    Per step only the ht//128 lane groups are folded together with elementwise
    (VPU) adds into a (bt, C, 128) f32 scratch; the single cross-lane reduce and
    the tiny fc1/fc2/sigmoid epilogue run once on the last step.
    """
    groups = ht // 128

    def kernel(x_ref, w1_ref, w2_ref, o_ref, acc_ref):
        k = pl.program_id(1)

        @pl.when(k == 0)
        def _init():
            acc_ref[...] = jnp.zeros_like(acc_ref)

        x = x_ref[...].astype(jnp.float32)                    # (bt, C, ht)
        part = x[:, :, 0:128]
        for g in range(1, groups):                            # static unroll; VPU adds only
            part = part + x[:, :, g * 128:(g + 1) * 128]
        acc_ref[...] += part

        @pl.when(k == pl.num_programs(1) - 1)
        def _finalize():
            pooled = jnp.sum(acc_ref[...], axis=-1) * inv_hw  # one XLU lane reduce
            _epilogue(pooled, w1_ref, w2_ref, o_ref)

    return kernel


def _make_multi_step_nhwc_kernel(bt: int, c: int, ht: int, inv_hw: float):
    """x blocks (bt, ht, C), C on lanes, ht % 8 == 0.

    Splitting the sublane dim by 8 is layout-preserving, so the per-step fold
    into a (bt, 8, C) scratch is pure elementwise (VPU) adds.
    """

    def kernel(x_ref, w1_ref, w2_ref, o_ref, acc_ref):
        k = pl.program_id(1)

        @pl.when(k == 0)
        def _init():
            acc_ref[...] = jnp.zeros_like(acc_ref)

        x = x_ref[...].astype(jnp.float32)                    # (bt, ht, C)
        acc_ref[...] += x.reshape(bt, ht // 8, 8, c).sum(axis=1)

        @pl.when(k == pl.num_programs(1) - 1)
        def _finalize():
            pooled = jnp.sum(acc_ref[...], axis=1) * inv_hw   # one sublane reduce
            _epilogue(pooled, w1_ref, w2_ref, o_ref)

    return kernel


# ----------------------------------------------------------------------------
# Tiling / VMEM heuristics
# ----------------------------------------------------------------------------
def _vmem_params():
    """(per-block byte budget, vmem_limit_bytes), derived from the actual chip."""
    try:
        cap = int(pltpu.get_tpu_info().vmem_capacity_bytes)
    except Exception:
        cap = 64 * 1024 * 1024            # conservative (v7x per-TensorCore VMEM)
    block_budget = min(16 * 1024 * 1024, cap // 5)    # ~12.8 MiB on v7x, 16 MiB on v5e/v6e
    vmem_limit = min(3 * cap // 4, 64 * 1024 * 1024)  # 48 MiB on v7x, 64 MiB on v5e/v6e
    return block_budget, vmem_limit


def _choose_tiles(B, C, HW, itemsize, block_budget, channels_last):
    """Pick (b_tile, hw_tile).

    b_tile : multiple-of-8 divisor of B (or full B); capped at B//2 when a legal
             candidate exists so the 'parallel' batch axis has >= 2 blocks (v7x).
    hw_tile: full HW if it fits the budget (single reduction step, no scratch);
             else the largest legal divisor (mult. of 128 for NCHW lanes, 8 for
             NHWC sublanes) that fits; else best-effort fallback.
    """
    b_cands = [d for d in range(8, B + 1, 8) if B % d == 0] or [B]
    two_block = [d for d in b_cands if d <= B // 2]
    if two_block:
        b_cands = two_block
    bt = b_cands[0]

    def fits(b, h):
        return b * C * h * itemsize <= block_budget

    if fits(bt, HW):
        ht = HW
    else:
        q = 8 if channels_last else 128
        legal = [d for d in range(q, HW, q) if HW % d == 0]
        fitting = [d for d in legal if fits(bt, d)]
        if fitting:
            ht = max(fitting)
        elif legal:
            ht = min(legal)        # best effort; vmem_limit is raised to cover it
        else:
            ht = HW                # no legal divisor -> single full-HW block

    for d in b_cands:              # grow the batch tile while it still fits
        if d > bt and fits(d, ht):
            bt = d
    return bt, ht


# ----------------------------------------------------------------------------
# Public wrapper
# ----------------------------------------------------------------------------
def se_block(x, w_fc1, w_fc2, *, channels_last=False, stream_dtype=jnp.bfloat16,
             b_tile=None, hw_tile=None):
    """SEBlock.forward.

    x    : (B, C, H, W) if channels_last=False (PyTorch NCHW), else (B, H, W, C).
    w_fc1: (MIP, C, 1, 1)  -- nn.Conv2d(C, MIP, 1, bias=False).weight
    w_fc2: (C, MIP)        -- nn.Linear(MIP, C, bias=False).weight
    Returns (B, C, 1, 1).  (self.bn is never applied -- matches the PyTorch forward.)
    """
    if channels_last:
        B, H, W, C = x.shape
    else:
        B, C, H, W = x.shape
    HW = H * W
    mip = w_fc1.shape[0]
    out_dtype = x.dtype

    x_flat = x.reshape(B, HW, C) if channels_last else x.reshape(B, C, HW)
    # Stream x at reduced precision: the kernel re-reads the full activation from HBM,
    # so halving its bytes is ~2x end-to-end; accumulation and the fc matmuls stay f32.
    # In a full network this cast fuses into the producer of x.
    if stream_dtype is not None and x_flat.dtype != jnp.dtype(stream_dtype):
        x_flat = x_flat.astype(stream_dtype)
    itemsize = jnp.dtype(x_flat.dtype).itemsize

    w1 = w_fc1.reshape(mip, C).T.astype(jnp.float32)   # (C, MIP)
    w2 = w_fc2.T.astype(jnp.float32)                   # (MIP, C)

    block_budget, vmem_limit = _vmem_params()
    bt_auto, ht_auto = _choose_tiles(B, C, HW, itemsize, block_budget, channels_last)
    bt = b_tile if b_tile is not None else bt_auto
    ht = hw_tile if hw_tile is not None else ht_auto

    assert B % bt == 0 and (bt % 8 == 0 or bt == B), f"bad b_tile={bt} for B={B}"
    hw_quantum = 8 if channels_last else 128
    assert HW % ht == 0 and (ht == HW or ht % hw_quantum == 0), \
        f"bad hw_tile={ht} for HW={HW} (channels_last={channels_last})"

    n_b, n_hw = B // bt, HW // ht
    grid = (n_b, n_hw)   # (parallel batch tiles, trailing 'arbitrary' HW reduction)
    inv_hw = 1.0 / HW

    if channels_last:
        x_block = (bt, ht, C)
        x_index_map = lambda b, k: (b, k, 0)
    else:
        x_block = (bt, C, ht)
        x_index_map = lambda b, k: (b, 0, k)

    # Small multi-step blocks: a 2-deep pipeline no longer hides the ~0.35us per-step
    # fixed cost; ask for a 3rd buffer (guarded so the script stays runnable on JAX
    # versions without pipeline_mode support).
    x_block_bytes = bt * C * ht * itemsize
    x_spec = pl.BlockSpec(x_block, x_index_map)
    if n_hw >= 3 and x_block_bytes < (1 << 20):
        try:
            x_spec = pl.BlockSpec(x_block, x_index_map, pipeline_mode=pl.Buffered(3))
        except Exception:
            pass

    if n_hw == 1:
        kernel = _make_single_step_kernel(inv_hw, channels_last)
        scratch_shapes = []
    elif channels_last:
        kernel = _make_multi_step_nhwc_kernel(bt, C, ht, inv_hw)
        scratch_shapes = [pltpu.VMEM((bt, 8, C), jnp.float32)]
    else:
        kernel = _make_multi_step_nchw_kernel(bt, C, ht, inv_hw)
        scratch_shapes = [pltpu.VMEM((bt, C, 128), jnp.float32)]

    cost = pl.CostEstimate(
        flops=B * C * HW + 2 * B * C * mip + 2 * B * mip * C,
        transcendentals=B * C,
        bytes_accessed=B * C * HW * itemsize + 2 * C * mip * 4
                       + B * C * jnp.dtype(out_dtype).itemsize,
    )

    out = pl.pallas_call(
        kernel,
        out_shape=jax.ShapeDtypeStruct((B, C), out_dtype),
        grid_spec=pltpu.PrefetchScalarGridSpec(
            num_scalar_prefetch=0,
            grid=grid,
            in_specs=[
                x_spec,
                pl.BlockSpec((C, mip), lambda b, k: (0, 0)),
                pl.BlockSpec((mip, C), lambda b, k: (0, 0)),
            ],
            out_specs=pl.BlockSpec((bt, C), lambda b, k: (b, 0)),
            scratch_shapes=scratch_shapes,
        ),
        compiler_params=pltpu.CompilerParams(
            dimension_semantics=("parallel", "arbitrary"),
            vmem_limit_bytes=max(vmem_limit, 3 * x_block_bytes + (8 << 20)),
        ),
        cost_estimate=cost,
    )(x_flat, w1, w2)

    return out.reshape(B, C, 1, 1)


# ----------------------------------------------------------------------------
# Pure-JAX reference (matches the PyTorch forward; self.bn is unused there)
# ----------------------------------------------------------------------------
def _reference(x_nchw, w_fc1, w_fc2):
    B, C, H, W = x_nchw.shape
    mip = w_fc1.shape[0]
    pooled = jnp.mean(x_nchw.astype(jnp.float32), axis=(2, 3))   # AdaptiveAvgPool2d(1)
    h = jnp.maximum(pooled @ w_fc1.reshape(mip, C).T, 0.0)       # fc1 + ReLU
    s = h @ w_fc2.T                                              # fc2
    return jax.nn.sigmoid(s)[:, :, None, None]                   # (B, C, 1, 1)


if __name__ == "__main__":
    key = jax.random.PRNGKey(0)

    # --- config 1: small early-stage-like shape, NCHW path -------------------
    B, C, H, W = 2, 64, 16, 16
    mip = max(8, C // 16)
    kx, k1, k2, key = jax.random.split(key, 4)
    x = jax.random.normal(kx, (B, C, H, W), dtype=jnp.float32)
    # kaiming_normal_(a=0, mode='fan_out') equivalents (deterministic):
    w_fc1 = jax.random.normal(k1, (mip, C, 1, 1), jnp.float32) * jnp.sqrt(2.0 / mip)
    w_fc2 = jax.random.normal(k2, (C, mip), jnp.float32) * jnp.sqrt(2.0 / C)
    y_ref = _reference(x, w_fc1, w_fc2)

    y_bf16 = se_block(x, w_fc1, w_fc2)                                   # bf16 stream (default)
    y_f32 = se_block(x, w_fc1, w_fc2, stream_dtype=None)                 # exact f32 path
    y_tiled = se_block(x, w_fc1, w_fc2, stream_dtype=None, hw_tile=128)  # multi-step reduction

    # --- config 2: late-stage-like shape, lane-dense-C (NHWC) path -----------
    B2, C2, H2, W2 = 8, 128, 8, 8
    mip2 = max(8, C2 // 16)
    kx2, k3, k4, key = jax.random.split(key, 4)
    x2 = jax.random.normal(kx2, (B2, C2, H2, W2), dtype=jnp.float32)
    w1_2 = jax.random.normal(k3, (mip2, C2, 1, 1), jnp.float32) * jnp.sqrt(2.0 / mip2)
    w2_2 = jax.random.normal(k4, (C2, mip2), jnp.float32) * jnp.sqrt(2.0 / C2)
    y2_ref = _reference(x2, w1_2, w2_2)
    x2_nhwc = jnp.transpose(x2, (0, 2, 3, 1))   # in production the producer emits NHWC directly

    y2 = se_block(x2_nhwc, w1_2, w2_2, channels_last=True)                                   # bf16, single shot
    y2_tiled = se_block(x2_nhwc, w1_2, w2_2, channels_last=True, stream_dtype=None, hw_tile=8)

    jax.block_until_ready((y_bf16, y_f32, y_tiled, y2, y2_tiled))

    assert y_bf16.shape == (B, C, 1, 1) and y2.shape == (B2, C2, 1, 1)
    assert jnp.allclose(y_f32, y_ref, atol=1e-5, rtol=1e-5)
    assert jnp.allclose(y_tiled, y_ref, atol=1e-5, rtol=1e-5)
    assert jnp.allclose(y_bf16, y_ref, atol=2e-2, rtol=0.0)
    assert jnp.allclose(y2_tiled, y2_ref, atol=1e-5, rtol=1e-5)
    assert jnp.allclose(y2, y2_ref, atol=2e-2, rtol=0.0)

    print("KERNEL_OK")
</pallas_src>

<mosaic_0001>
module attributes {stable_mosaic.version = 11 : i64} {
  func.func @kernel(%arg0: i32, %arg1: i32, %arg2: memref<2x64x256xbf16, #tpu.memory_space<vmem>>, %arg3: memref<64x8xf32, #tpu.memory_space<vmem>>, %arg4: memref<8x64xf32, #tpu.memory_space<vmem>>, %arg5: memref<2x64xf32, #tpu.memory_space<vmem>>) attributes {dimension_semantics = [#tpu.dimension_semantics<parallel>, #tpu.dimension_semantics<arbitrary>], iteration_bounds = array<i64: 1, 1>, scalar_prefetch = 0 : i64, scratch_operands = 0 : i64, tpu.core_type = #tpu.core_type<tc>, window_params = [{transform_indices = @transform_0, window_bounds = array<i64: 2, 64, 256>}, {pipeline_mode = #tpu.pipeline_mode<synchronous>, transform_indices = @transform_1, window_bounds = array<i64: 64, 8>}, {pipeline_mode = #tpu.pipeline_mode<synchronous>, transform_indices = @transform_2, window_bounds = array<i64: 8, 64>}, {transform_indices = @transform_3, window_bounds = array<i64: 2, 64>}]} {
    %c0 = arith.constant 0 : index
    %c0_0 = arith.constant 0 : index
    %c0_1 = arith.constant 0 : index
    %0 = vector.load %arg2[%c0, %c0_0, %c0_1] : memref<2x64x256xbf16, #tpu.memory_space<vmem>>, vector<2x64x256xbf16>
    %1 = arith.extf %0 : vector<2x64x256xbf16> to vector<2x64x256xf32>
    %cst = arith.constant dense<0.000000e+00> : vector<2x64xf32>
    %2 = vector.multi_reduction <add>, %1, %cst [2] : vector<2x64x256xf32> to vector<2x64xf32>
    %cst_2 = arith.constant 3.906250e-03 : f32
    %3 = vector.broadcast %cst_2 : f32 to vector<2x64xf32>
    %4 = arith.mulf %2, %3 : vector<2x64xf32>
    %c0_3 = arith.constant 0 : index
    %c0_4 = arith.constant 0 : index
    %5 = vector.load %arg3[%c0_3, %c0_4] : memref<64x8xf32, #tpu.memory_space<vmem>>, vector<64x8xf32>
    %cst_5 = arith.constant dense<0.000000e+00> : vector<2x8xf32>
    %6 = tpu.matmul %4, %5, %cst_5 {dimension_numbers = #tpu.dot_dimension_numbers<[1], [0], [0], [1], [0, 0, 1, 1], [], []>} : vector<2x64xf32>, vector<64x8xf32>, vector<2x8xf32> -> vector<2x8xf32>
    %cst_6 = arith.constant 0.000000e+00 : f32
    %7 = vector.broadcast %cst_6 : f32 to vector<2x8xf32>
    %8 = arith.maximumf %6, %7 : vector<2x8xf32>
    %c0_7 = arith.constant 0 : index
    %c0_8 = arith.constant 0 : index
    %9 = vector.load %arg4[%c0_7, %c0_8] : memref<8x64xf32, #tpu.memory_space<vmem>>, vector<8x64xf32>
    %cst_9 = arith.constant dense<0.000000e+00> : vector<2x64xf32>
    %10 = tpu.matmul %8, %9, %cst_9 {dimension_numbers = #tpu.dot_dimension_numbers<[1], [0], [0], [1], [0, 0, 1, 1], [], []>} : vector<2x8xf32>, vector<8x64xf32>, vector<2x64xf32> -> vector<2x64xf32>
    %11 = arith.negf %10 : vector<2x64xf32>
    %12 = math.exp %11 : vector<2x64xf32>
    %cst_10 = arith.constant 1.000000e+00 : f32
    %13 = vector.broadcast %cst_10 : f32 to vector<2x64xf32>
    %14 = arith.addf %13, %12 : vector<2x64xf32>
    %15 = arith.divf %13, %14 : vector<2x64xf32>
    %c0_11 = arith.constant 0 : index
    %c0_12 = arith.constant 0 : index
    %16 = vector.load %arg5[%c0_11, %c0_12] : memref<2x64xf32, #tpu.memory_space<vmem>>, vector<2x64xf32>
    tpu.vector_store %arg5[%c0_11, %c0_12], %15 {strides = array<i32>} : memref<2x64xf32, #tpu.memory_space<vmem>>, vector<2x64xf32>,
    return
  }
  func.func @transform_0(%arg0: i32, %arg1: i32) -> (i32, i32, i32) {
    %c0_i32 = arith.constant 0 : i32
    %c0_i32_0 = arith.constant 0 : i32
    return %arg0, %c0_i32, %arg1 : i32, i32, i32
  }
  func.func @transform_1(%arg0: i32, %arg1: i32) -> (i32, i32) {
    %c0_i32 = arith.constant 0 : i32
    %c0_i32_0 = arith.constant 0 : i32
    %c0_i32_1 = arith.constant 0 : i32
    return %c0_i32, %c0_i32_0 : i32, i32
  }
  func.func @transform_2(%arg0: i32, %arg1: i32) -> (i32, i32) {
    %c0_i32 = arith.constant 0 : i32
    %c0_i32_0 = arith.constant 0 : i32
    %c0_i32_1 = arith.constant 0 : i32
    return %c0_i32, %c0_i32_0 : i32, i32
  }
  func.func @transform_3(%arg0: i32, %arg1: i32) -> (i32, i32) {
    %c0_i32 = arith.constant 0 : i32
    %c0_i32_0 = arith.constant 0 : i32
    return %arg0, %c0_i32 : i32, i32
  }
}

</mosaic_0001>

<bundles_post_ra>
// kernel: tpu_custom_call.1
= control target key start
LH: loop header
LB: loop body
LE: loop exit
PB: predicated region body
PF: predicated region fallthrough
CT: control target
= control target key end

     0   :  { %8 = vsyncpa [#allocation3], 0  ;;  %s430_s0 = inlined_call_operand.hbm [shape: bf16[2,64,256], index: 0, kind: input, shape index: {}]   ;;  %s431_s1 = inlined_call_operand.vmem [shape: f32[64,8], index: 1, kind: input, shape index: {}]   ;;  %s432_s2 = inlined_call_operand.vmem [shape: f32[8,64], index: 2, kind: input, shape index: {}]   ;;  %s433_s3 = inlined_call_operand.hbm [shape: f32[2,64], index: 3, kind: output, shape index: {}]  }
   0x1   :  { %9 = vsyncpa [#allocation4], 0  ;;  %s14_s14 = sshll.u32 %s430_s0, 4  ;;  %s365_s15 = smov [#allocation2]   ;;  %s15_s14 = int_to_ptr.hbm [resolvable:$true] %s14_s14 }
   0x2   :  { %s16_s16 = sshll.u32 %s365_s15, 4  ;;  %s366_s17 = smov 128   ;;  %s17_s16 = int_to_ptr.vmem [resolvable:$true] %s16_s16 }
   0x3   :  { %s367_s18 = smov 8  }
   0x4   :  { %22 = dma.hbm_to_vmem [thread:$0]  %s15_s14, 2048, %s17_s16, [#allocation3], %s366_s17, %s366_s17, %s367_s18  }
   0x5   :  { %361 = dma.done.wait [#allocation3], 2048  }
   0x6   :  { %362 = vsyncadd [#allocation3], 4294965248  ;;  %v39_v0 = vld [vmem:[#allocation2 + $0x40] sm:$0xff]  ;;  %v33_v2 = vld [vmem:[#allocation2 + $0x10] sm:$0xff]  ;;  %vm172_vm0 = vcmask 130112   ;;  %vm176_vm1 = vcmask 195712  }
   0x7   :  { %v31_v1 = vld [vmem:[#allocation2] sm:$0xff]  ;;  %v63_v3 = vunpack.c.l.bf16 %v39_v0  ;;  %v64_v4 = vunpack.c.h.bf16 %v39_v0  ;;  %v51_v7 = vunpack.c.l.bf16 %v33_v2  ;;  %v52_v8 = vunpack.c.h.bf16 %v33_v2  ;;  %v40_v9 = vld [vmem:[#allocation2 + $0x48] sm:$0xff]  ;;  %v41_v13 = vld [vmem:[#allocation2 + $0x50] sm:$0xff]  ;;  %s368_s8 = smov [#allocation5]   ;;  %s292_s11 = sshll.u32 %s433_s3, 4  ;;  %s293_s11 = int_to_ptr.hbm [resolvable:$true] %s292_s11 }
   0x8   :  { %v47_v5 = vunpack.c.l.bf16 %v31_v1  ;;  %v48_v6 = vunpack.c.h.bf16 %v31_v1  ;;  %v32_v10 = vld [vmem:[#allocation2 + $0x8] sm:$0xff]  ;;  %v65_v15 = vunpack.c.l.bf16 %v40_v9  ;;  %v66_v16 = vunpack.c.h.bf16 %v40_v9  ;;  %v42_v24 = vld [vmem:[#allocation2 + $0x58] sm:$0xff]  ;;  %v35_v26 = vld [vmem:[#allocation2 + $0x20] sm:$0xff] }
   0x9   :  { %v103_v11 = vadd.f32 %v64_v4, %v63_v3  ;;  %v85_v14 = vadd.f32 %v52_v8, %v51_v7  ;;  %v49_v17 = vunpack.c.l.bf16 %v32_v10  ;;  %v50_v18 = vunpack.c.h.bf16 %v32_v10  ;;  %v34_v25 = vld [vmem:[#allocation2 + $0x18] sm:$0xff]  ;;  %v36_v36 = vld [vmem:[#allocation2 + $0x28] sm:$0xff]  ;;  %v43_v37 = vld [vmem:[#allocation2 + $0x60] sm:$0xff] }
   0xa   :  { %v79_v12 = vadd.f32 %v48_v6, %v47_v5  ;;  %v67_v19 = vunpack.c.l.bf16 %v41_v13  ;;  %v68_v20 = vunpack.c.h.bf16 %v41_v13  ;;  %v106_v21 = vadd.f32 %v66_v16, %v65_v15  ;;  %v44_v38 = vld [vmem:[#allocation2 + $0x68] sm:$0xff]  ;;  %v45_v48 = vld [vmem:[#allocation2 + $0x70] sm:$0xff]  ;;  %v38_v50 = vld [vmem:[#allocation2 + $0x38] sm:$0xff] }
   0xb   :  { %104 = vadd.xlane.f32.xlu1 %v103_v11  ;;  %86 = vadd.xlane.f32.xlu2 %v85_v14  ;;  %v82_v22 = vadd.f32 %v50_v18, %v49_v17  ;;  %v69_v27 = vunpack.c.l.bf16 %v42_v24  ;;  %v70_v28 = vunpack.c.h.bf16 %v42_v24  ;;  %v53_v29 = vunpack.c.l.bf16 %v34_v25  ;;  %v37_v49 = vld [vmem:[#allocation2 + $0x30] sm:$0xff]  ;;  %v46_v60 = vld [vmem:[#allocation2 + $0x78] sm:$0xff]  ;;  %v148_v5 = vld [vmem:[%s431_s1 + $0x28] sm:$0xff] }
   0xc   :  { %80 = vadd.xlane.f32.xlu0 %v79_v12  ;;  %v109_v23 = vadd.f32 %v68_v20, %v67_v19  ;;  %v54_v30 = vunpack.c.h.bf16 %v34_v25  ;;  %v55_v31 = vunpack.c.l.bf16 %v35_v26  ;;  %v56_v32 = vunpack.c.h.bf16 %v35_v26  ;;  %v150_v0 = vld [vmem:[%s431_s1 + $0x38] sm:$0xff]  ;;  %v149_v4 = vld [vmem:[%s431_s1 + $0x30] sm:$0xff]  ;;  %v147_v6 = vld [vmem:[%s431_s1 + $0x20] sm:$0xff] }
   0xd   :  { %v112_v33 = vadd.f32 %v70_v28, %v69_v27  ;;  %v57_v39 = vunpack.c.l.bf16 %v36_v36  ;;  %v58_v40 = vunpack.c.h.bf16 %v36_v36  ;;  %v71_v41 = vunpack.c.l.bf16 %v43_v37  ;;  %226 = vmatpush.msra.mxu0 %v150_v0  ;;  %v146_v7 = vld [vmem:[%s431_s1 + $0x18] sm:$0xff]  ;;  %v145_v11 = vld [vmem:[%s431_s1 + $0x10] sm:$0xff]  ;;  %v144_v12 = vld [vmem:[%s431_s1 + $0x8] sm:$0xff] }
   0xe   :  { %v88_v34 = vadd.f32 %v54_v30, %v53_v29  ;;  %v91_v35 = vadd.f32 %v56_v32, %v55_v31  ;;  %v72_v42 = vunpack.c.h.bf16 %v43_v37  ;;  %v73_v43 = vunpack.c.l.bf16 %v44_v38  ;;  %v143_v13 = vld [vmem:[%s431_s1] sm:$0xff] }
   0xf   :  { %v74_v44 = vunpack.c.h.bf16 %v44_v38  ;;  %v94_v45 = vadd.f32 %v58_v40, %v57_v39  ;;  %v75_v51 = vunpack.c.l.bf16 %v45_v48  ;;  %v76_v52 = vunpack.c.h.bf16 %v45_v48  ;;  %227 = vmatpush.msra.mxu0 %v149_v4 }
  0x10   :  { %v115_v46 = vadd.f32 %v72_v42, %v71_v41  ;;  %v59_v53 = vunpack.c.l.bf16 %v37_v49  ;;  %v60_v54 = vunpack.c.h.bf16 %v37_v49  ;;  %v61_v55 = vunpack.c.l.bf16 %v38_v50 }
  0x11   :  { %v118_v47 = vadd.f32 %v74_v44, %v73_v43  ;;  %v62_v56 = vunpack.c.h.bf16 %v38_v50  ;;  %v121_v57 = vadd.f32 %v76_v52, %v75_v51  ;;  %v77_v61 = vunpack.c.l.bf16 %v46_v60  ;;  %228 = vmatpush.msra.mxu0 %v148_v5 }
  0x12   :  { %v97_v58 = vadd.f32 %v60_v54, %v59_v53  ;;  %v78_v62 = vunpack.c.h.bf16 %v46_v60  ;;  %v167_v17 = vlaneseq  ;;  %vm180_vm2 = vcmask 261312  }
  0x13   :  { %107 = vadd.xlane.f32.xlu1 %v106_v21  ;;  %110 = vadd.xlane.f32.xlu2 %v109_v23  ;;  %v100_v59 = vadd.f32 %v62_v56, %v61_v55  ;;  %vm184_vm3 = vcmask 326912   ;;  %vm188_vm4 = vcmask 392512   ;;  %vm192_vm5 = vcmask 458112  }
  0x14   :  { %83 = vadd.xlane.f32.xlu0 %v82_v22  ;;  %v124_v63 = vadd.f32 %v78_v62, %v77_v61  ;;  %229 = vmatpush.msra.mxu0 %v147_v6  ;;  %v168_v18 = vand.u32 127, %v167_v17  ;;  %vm196_vm6 = vcmask 523712   ;;  %vm213_vm7 = vcmask 1041409  }
  0x15   :  { %vm215_vm8 = vcmask 523264   ;;  %vm240_vm9 = vcmask 64512   ;;  %vm283_vm13 = vcmask 517120  }
  0x16   :  { %230 = vmatpush.msra.mxu0 %v146_v7  ;;  %v170_v21 = vadd.s32 4294967288, %v168_v18  ;;  %v174_v27 = vadd.s32 4294967280, %v168_v18  ;;  %v178_v30 = vadd.s32 4294967272, %v168_v18  ;;  %v182_v38 = vadd.s32 4294967264, %v168_v18 }
  0x17   :  { %v186_v44 = vadd.s32 4294967256, %v168_v18  ;;  %v190_v48 = vadd.s32 4294967248, %v168_v18  ;;  %v194_v60 = vadd.s32 4294967240, %v168_v18 }
  0x18   :  { %231 = vmatpush.msra.mxu0 %v145_v11 }
  0x1a   :  { %232 = vmatpush.msra.mxu0 %v144_v12 }
  0x1b   :  { %113 = vadd.xlane.f32.xlu1 %v112_v33  ;;  %92 = vadd.xlane.f32.xlu2 %v91_v35 }
  0x1c   :  { %89 = vadd.xlane.f32.xlu0 %v88_v34  ;;  %233 = vmatpush.msra.mxu0 %v143_v13 }
  0x23   :  { %95 = vadd.xlane.f32.xlu1 %v94_v45  ;;  %119 = vadd.xlane.f32.xlu2 %v118_v47 }
  0x24   :  { %116 = vadd.xlane.f32.xlu0 %v115_v46 }
  0x2b   :  { %122 = vadd.xlane.f32.xlu1 %v121_v57  ;;  %101 = vadd.xlane.f32.xlu2 %v100_v59 }
  0x2c   :  { %98 = vadd.xlane.f32.xlu0 %v97_v58 }
  0x34   :  { %125 = vadd.xlane.f32.xlu0 %v124_v63 }
  0x7e   :  { %v105_v1 = vpop.xlane.xlu1 %104  ;;  %v87_v3 = vpop.xlane.xlu2 %86 }
  0x7f   :  { %v81_v2 = vpop.xlane.xlu0 %80  ;;  %v135_v24 = vmul.f32 0.00390625, %v105_v1  ;;  %v129_v28 = vmul.f32 0.00390625, %v87_v3 }
  0x80   :  { %v127_v25 = vmul.f32 0.00390625, %v81_v2 }
  0x81   :  { %v198_v33 = vperm.slane %v135_v24, %v168_v18  ;;  %v175_v37 = vperm.slane %v129_v28, %v174_v27 }
  0x82   :  { %v169_v34 = vperm.slane %v127_v25, %v168_v18 }
  0x86   :  { %v108_v8 = vpop.xlane.xlu1 %107  ;;  %v111_v10 = vpop.xlane.xlu2 %110 }
  0x87   :  { %v84_v9 = vpop.xlane.xlu0 %83  ;;  %v136_v26 = vmul.f32 0.00390625, %v108_v8  ;;  %v137_v32 = vmul.f32 0.00390625, %v111_v10 }
  0x88   :  { %v128_v22 = vmul.f32 0.00390625, %v84_v9 }
  0x89   :  { %v199_v35 = vperm.slane %v136_v26, %v170_v21  ;;  %v201_v47 = vperm.slane %v137_v32, %v174_v27 }
  0x8a   :  { %v171_v29 = vperm.slane %v128_v22, %v170_v21 }
  0x8b   :  { %v200_v51 = vsel %vm172_vm0, %v199_v35, %v198_v33 }
  0x8c   :  { %v173_v42 = vsel %vm172_vm0, %v171_v29, %v169_v34  ;;  %v202_v62 = vsel %vm176_vm1, %v201_v47, %v200_v51 }
  0x8d   :  { %v177_v54 = vsel %vm176_vm1, %v175_v37, %v173_v42 }
  0x8e   :  { %v114_v14 = vpop.xlane.xlu1 %113  ;;  %v93_v16 = vpop.xlane.xlu2 %92 }
  0x8f   :  { %v90_v15 = vpop.xlane.xlu0 %89  ;;  %v138_v36 = vmul.f32 0.00390625, %v114_v14  ;;  %v131_v39 = vmul.f32 0.00390625, %v93_v16  ;;  %v239_v16 = vld [vmem:[%s432_s2] sm:$0xff]  ;;  %s290_s2 = sshll.u32 %s368_s8, 4  ;;  %s291_s2 = int_to_ptr.vmem [resolvable:$true] %s290_s2 }
  0x90   :  { %v130_v31 = vmul.f32 0.00390625, %v90_v15  ;;  %259 = vmatpush.msra.mxu1 %v239_v16 }
  0x91   :  { %v203_v52 = vperm.slane %v138_v36, %v178_v30  ;;  %v183_v55 = vperm.slane %v131_v39, %v182_v38 }
  0x92   :  { %v179_v43 = vperm.slane %v130_v31, %v178_v30 }
  0x93   :  { %v204_v0 = vsel %vm180_vm2, %v203_v52, %v202_v62 }
  0x94   :  { %v181_v58 = vsel %vm180_vm2, %v179_v43, %v177_v54 }
  0x95   :  { %v185_v2 = vsel %vm184_vm3, %v183_v55, %v181_v58 }
  0x96   :  { %v96_v19 = vpop.xlane.xlu1 %95  ;;  %v120_v23 = vpop.xlane.xlu2 %119 }
  0x97   :  { %v117_v20 = vpop.xlane.xlu0 %116  ;;  %v132_v45 = vmul.f32 0.00390625, %v96_v19  ;;  %v140_v53 = vmul.f32 0.00390625, %v120_v23 }
  0x98   :  { %v139_v40 = vmul.f32 0.00390625, %v117_v20 }
  0x99   :  { %v187_v59 = vperm.slane %v132_v45, %v186_v44  ;;  %v207_v1 = vperm.slane %v140_v53, %v186_v44 }
  0x9a   :  { %v205_v56 = vperm.slane %v139_v40, %v182_v38 }
  0x9b   :  { %v189_v6 = vsel %vm188_vm4, %v187_v59, %v185_v2 }
  0x9c   :  { %v206_v3 = vsel %vm184_vm3, %v205_v56, %v204_v0 }
  0x9d   :  { %v208_v10 = vsel %vm188_vm4, %v207_v1, %v206_v3 }
  0x9e   :  { %v123_v46 = vpop.xlane.xlu1 %122  ;;  %v102_v50 = vpop.xlane.xlu2 %101 }
  0x9f   :  { %v99_v41 = vpop.xlane.xlu0 %98  ;;  %v141_v57 = vmul.f32 0.00390625, %v123_v46  ;;  %v134_v61 = vmul.f32 0.00390625, %v102_v50 }
  0xa0   :  { %v133_v49 = vmul.f32 0.00390625, %v99_v41 }
  0xa1   :  { %v209_v4 = vperm.slane %v141_v57, %v190_v48  ;;  %v195_v7 = vperm.slane %v134_v61, %v194_v60 }
  0xa2   :  { %v191_v63 = vperm.slane %v133_v49, %v190_v48 }
  0xa3   :  { %v210_v12 = vsel %vm192_vm5, %v209_v4, %v208_v10 }
  0xa4   :  { %v193_v9 = vsel %vm192_vm5, %v191_v63, %v189_v6 }
  0xa5   :  { %v197_v13 = vsel %vm196_vm6, %v195_v7, %v193_v9 }
  0xa7   :  { %v126_v5 = vpop.xlane.xlu0 %125 }
  0xa8   :  { %v142_v8 = vmul.f32 0.00390625, %v126_v5 }
  0xaa   :  { %v211_v11 = vperm.slane %v142_v8, %v194_v60 }
  0xac   :  { %v212_v14 = vsel %vm196_vm6, %v211_v11, %v210_v12 }
  0xad   :  { %v214_v15 = vsel %vm213_vm7, %v212_v14, %v197_v13 }
  0xae   :  { %302 = vmatmul.msk.f32.vlgmr.msra.gmra.mxu0 %vm215_vm8, %v214_v15 }
 0x12b   :  { %v235_v17 = vpop.f32.mrf.mxu0 }
 0x12c   :  { %v238_v18 = vmax.f32 %v235_v17, 0.0 }
 0x12e   :  { %303 = vmatmul.msk.f32.vlgmr.msra.gmra.mxu1 %vm240_vm9, %v238_v18 }
 0x1ab   :  { %v261_v19 = vpop.f32.mrf.mxu1 }
 0x1ac   :  { %v304_v20 = vmul.f32 -1.442695, %v261_v19 }
 0x1ae   :  { %309 = vpow2.f32 %v304_v20 }
 0x1b4   :  { %v310_v21 = vpop.eup %309 }
 0x1b5   :  { %v267_v22 = vadd.f32 1.0, %v310_v21 }
 0x1b7   :  { %311 = vrcp.f32 %v267_v22  ;;  %v279_v26 = vand.u32 2147483648, %v267_v22  ;;  %v277_v28 = vand.u32 2147483647, %v267_v22  ;;  %vm273_vm11 = vweird.f32 %v267_v22 }
 0x1b9   :  { %v280_v30 = vor.u32 1.1754944e-38, %v279_v26  ;;  %vm278_vm14 = vcmp.eq.f32.partialorder %v277_v28, 8.507059e+37 }
 0x1bd   :  { %v312_v23 = vpop.eup %311 }
 0x1be   :  { %v269_v24 = vmul.f32 %v312_v23, %v267_v22  ;;  %vm274_vm10 = vweird.f32 %v312_v23 }
 0x1bf   :  { %vm275_vm12 = vmor %vm273_vm11, %vm274_vm10 }
 0x1c0   :  { %v270_v25 = vsub.f32 1.0, %v269_v24 }
 0x1c2   :  { %v271_v27 = vmul.f32 %v312_v23, %v270_v25 }
 0x1c4   :  { %v272_v29 = vadd.f32 %v312_v23, %v271_v27 }
 0x1c6   :  { %v276_v31 = vsel %vm275_vm12, %v312_v23, %v272_v29 }
 0x1c7   :  { %v281_v32 = vsel %vm278_vm14, %v280_v30, %v276_v31 }
 0x1c8   :  { %284 = vst.msk [vmem:[#allocation5] sm:$0x3] %vm283_vm13, %v281_v32 }
 0x1c9   :  { %295 = dma.vmem_to_hbm [thread:$0]  %s291_s2, 32, %s293_s11, [#allocation4]  }
 0x1ca   :  { %363 = dma.done.wait [#allocation4], 32  }
 0x1cb   :  { %364 = vsyncadd [#allocation4], 4294967264 }
 0x1cc   :  { %300 = vsyncpa [#allocation3], 1 }
 0x1cd   :  { %301 = vsyncpa [#allocation4], 1 }

</bundles_post_ra>
